<compile_context>
chip_gen: v7x
topology: tpu7x:2x2x1
jax: 0.10.0
libtpu: 0.0.40
codegen_flags: <defaults>
</compile_context>

<pallas_src>
import functools

import numpy as np

import jax
import jax.numpy as jnp
from jax.experimental import pallas as pl
from jax.experimental.pallas import tpu as pltpu

_VMEM_BUDGET_BYTES = 36 * 1024 * 1024   # accounted working set per grid step
_VMEM_LIMIT_BYTES = 48 * 1024 * 1024    # scoped limit handed to Mosaic (< v7x 64 MiB)


def _filter_2d(der_filter):
    w = np.asarray(der_filter, dtype=np.float64)
    k = int(w.shape[-1])
    assert int(w.shape[-2]) == k, "derivative filter must be square"
    return w.reshape(k, k), k, (k - 1) // 2


def _build_circulants(der_filter, resol, H, W):
    """Fold circular padding + filter weights + 1/resol into per-row constants.

    Returns:
      C:      (Ka, W, W) float32 column-circulant matrices, one per active filter row:
              (row_vec @ C[r])[j] = sum_dj w[ki_r, dj+PAD] * row_vec[(j+dj) % W]
      shifts: tuple of Ka static sublane-roll amounts s_r = (PAD - ki_r) % H so that
              roll(x, s_r, axis=0)[i, :] = x[(i + ki_r - PAD) % H, :]
    giving  y = sum_r roll(x, s_r, axis=0) @ C[r]
            = circular-padded cross-correlation(x, w) / resol  (PyTorch Conv2d semantics).
    """
    w, K, PAD = _filter_2d(der_filter)
    w = w / float(resol)

    active = [ki for ki in range(K) if np.any(w[ki] != 0.0)]
    if not active:                        # degenerate all-zero filter
        active = [PAD]

    C = np.zeros((len(active), W, W), np.float32)
    shifts = []
    for r, ki in enumerate(active):
        shifts.append(int((PAD - ki) % H))
        for dj in range(-PAD, PAD + 1):
            wv = w[ki, dj + PAD]
            if wv == 0.0:
                continue
            for j in range(W):
                C[r, (j + dj) % W, j] += np.float32(wv)
    return jnp.asarray(C), tuple(shifts)


def _build_row_perms(shifts, H):
    """(H,H) permutation matrices equivalent to the sublane rolls (fallback path only)."""
    P = np.zeros((len(shifts), H, H), np.float32)
    for r, s in enumerate(shifts):
        for i in range(H):
            P[r, i, (i - s) % H] = 1.0
    return jnp.asarray(P)


def _conv_deriv_kernel(c_ref, x_ref, o_ref, *, shifts):
    """Primary kernel: XLU sublane rolls + one batched MXU matmul per active filter row.

    c_ref: (Ka, W, W) VMEM  -- column circulants (weights / resol folded in)
    x_ref: (TB, H, W) VMEM  -- input block (TB images)
    o_ref: (TB, H, W) VMEM  -- derivative output block
    """
    tb, H, _ = x_ref.shape
    xs = [x_ref[b].astype(jnp.float32) for b in range(tb)]       # TB (H, W) loads

    acc = None                                                   # (TB*H, W) f32
    for r, s in enumerate(shifts):
        rolled = [pltpu.roll(xb, s, 0) if s else xb for xb in xs]
        lhs = rolled[0] if tb == 1 else jnp.concatenate(rolled, axis=0)
        term = jnp.dot(lhs, c_ref[r], preferred_element_type=jnp.float32)
        acc = term if acc is None else acc + term

    for b in range(tb):                                          # 8-aligned row slabs
        o_ref[b] = acc[b * H:(b + 1) * H, :].astype(o_ref.dtype)


def _conv_deriv_kernel_pmat(p_ref, c_ref, x_ref, o_ref):
    """Fallback kernel (known-good): row shift realized as a permutation matmul."""
    tb = x_ref.shape[0]
    ka = p_ref.shape[0]
    for b in range(tb):
        xb = x_ref[b].astype(jnp.float32)
        acc = jnp.zeros(xb.shape, jnp.float32)
        for r in range(ka):
            rows = jnp.dot(p_ref[r], xb, preferred_element_type=jnp.float32)
            acc = acc + jnp.dot(rows, c_ref[r], preferred_element_type=jnp.float32)
        o_ref[b] = acc.astype(o_ref.dtype)


def _choose_block_batch(N, H, W, Ka):
    """VMEM-budgeted batch block; keeps the parallel grid even (>=2) when possible."""
    per_image = H * W * 4
    const_bytes = 2 * Ka * W * W * 4            # C is double-buffered by the pipeline
    # ~(Ka + 6) live copies of a (TB,H,W) slab per step: 2x in + 2x out pipeline
    # buffers, rolled copies / accumulator, plus slack for register/VMEM temporaries.
    denom = per_image * (Ka + 6)
    tb_mem = max(1, (_VMEM_BUDGET_BYTES - const_bytes) // denom)
    tb = int(min(tb_mem, 8, (max(1, N // 2) if N > 1 else 1)))
    tb = max(tb, 1)
    # v7x has 2 TensorCores on the single "parallel" grid axis: keep n_blocks even.
    while tb > 1 and (-(-N // tb)) % 2 == 1:
        tb -= 1
    return tb


def conv2d_derivative(x, der_filter, resol, *, block_batch=None):
    """Pallas equivalent of Conv2dDerivative.forward.

    x:          (N, 1, H, W) float32 (NCHW, single channel)
    der_filter: (1, 1, K, K) / (K, K) / nested list -- fixed (non-traced) filter
    resol:      python float, e.g. dx**2
    returns:    (N, 1, H, W) float32
    """
    x = jnp.asarray(x, jnp.float32)
    N, ch, H, W = x.shape
    assert ch == 1, "Conv2dDerivative has a single input channel"
    xs = x[:, 0]                                     # (N, H, W)

    C, shifts = _build_circulants(der_filter, resol, H, W)
    Ka = C.shape[0]

    tb = _choose_block_batch(N, H, W, Ka) if block_batch is None else int(block_batch)
    if H % 8 != 0:
        tb = 1          # batched row-concat path needs sublane-tile-aligned images
    tb = max(1, min(tb, N))
    n_blocks = -(-N // tb)
    n_pad = n_blocks * tb
    if n_pad != N:
        xs = jnp.concatenate(
            [xs, jnp.zeros((n_pad - N, H, W), xs.dtype)], axis=0)

    common = dict(
        out_shape=jax.ShapeDtypeStruct((n_pad, H, W), jnp.float32),
        grid=(n_blocks,),
        out_specs=pl.BlockSpec((tb, H, W), lambda n: (n, 0, 0)),
        compiler_params=pltpu.CompilerParams(
            dimension_semantics=("parallel",),
            vmem_limit_bytes=_VMEM_LIMIT_BYTES),
    )

    try:
        out = pl.pallas_call(
            functools.partial(_conv_deriv_kernel, shifts=shifts),
            in_specs=[
                pl.BlockSpec((Ka, W, W), lambda n: (0, 0, 0)),   # resident constant
                pl.BlockSpec((tb, H, W), lambda n: (n, 0, 0)),
            ],
            **common)(C, xs)
        out = jax.block_until_ready(out)
    except Exception:
        # Safety net: if this Mosaic build rejects the roll/concat lowering, fall back
        # to the (slower but known-good) permutation-matmul Pallas kernel.
        P = _build_row_perms(shifts, H)
        out = pl.pallas_call(
            _conv_deriv_kernel_pmat,
            in_specs=[
                pl.BlockSpec((Ka, H, H), lambda n: (0, 0, 0)),
                pl.BlockSpec((Ka, W, W), lambda n: (0, 0, 0)),
                pl.BlockSpec((tb, H, W), lambda n: (n, 0, 0)),
            ],
            **common)(P, C, xs)

    return out[:N][:, None, :, :]                    # back to NCHW


def _reference(x, der_filter, resol):
    """Pure-JAX reference: circular pad + K*K-tap shift-and-accumulate."""
    w64, K, PAD = _filter_2d(der_filter)
    w = jnp.asarray(w64, jnp.float32)
    xs = jnp.asarray(x, jnp.float32)[:, 0]
    xpad = jnp.pad(xs, ((0, 0), (PAD, PAD), (PAD, PAD)), mode="wrap")
    H, W = xs.shape[1], xs.shape[2]
    acc = jnp.zeros_like(xs)
    for ki in range(K):
        for kj in range(K):
            acc = acc + w[ki, kj] * xpad[:, ki:ki + H, kj:kj + W]
    return (acc / float(resol))[:, None, :, :]


def _max_rel_err(y, y_ref):
    return float(jnp.max(jnp.abs(y - y_ref)) / (jnp.max(jnp.abs(y_ref)) + 1e-12))


if __name__ == "__main__":
    key = jax.random.PRNGKey(0)
    k1, k2, k3 = jax.random.split(key, 3)
    dx = 1.0 / 16.0

    # Test 1: 4th-order Laplacian used in the Burgers script (symmetric), resol = dx^2.
    lapl_filter = [[[[0.0,        0.0,      -1.0 / 12.0,  0.0,       0.0],
                     [0.0,        0.0,        4.0 / 3.0,  0.0,       0.0],
                     [-1.0 / 12., 4.0 / 3.0,       -5.0,  4.0 / 3.0, -1.0 / 12.],
                     [0.0,        0.0,        4.0 / 3.0,  0.0,       0.0],
                     [0.0,        0.0,      -1.0 / 12.0,  0.0,       0.0]]]]
    x = jax.random.normal(k1, (2, 1, 16, 16), dtype=jnp.float32)
    y = jax.block_until_ready(conv2d_derivative(x, lapl_filter, dx * dx))
    assert y.shape == (2, 1, 16, 16)
    err = _max_rel_err(y, _reference(x, lapl_filter, dx * dx))
    assert err < 1e-4, f"Laplacian relative error too large: {err}"

    # Test 2: fully asymmetric random filter (catches roll-direction / transpose bugs
    # that the symmetric Laplacian would mask), resol = dx.
    rnd_filter = jax.random.normal(k2, (1, 1, 5, 5), dtype=jnp.float32)
    y2 = jax.block_until_ready(conv2d_derivative(x, rnd_filter, dx))
    err2 = _max_rel_err(y2, _reference(x, rnd_filter, dx))
    assert err2 < 1e-4, f"asymmetric-filter relative error too large: {err2}"

    # Test 3: batched-M path (block_batch > 1 -> single M=TB*H matmul per filter row).
    x3 = jax.random.normal(k3, (4, 1, 16, 16), dtype=jnp.float32)
    y3 = jax.block_until_ready(conv2d_derivative(x3, rnd_filter, dx, block_batch=2))
    err3 = _max_rel_err(y3, _reference(x3, rnd_filter, dx))
    assert err3 < 1e-4, f"batched-path relative error too large: {err3}"

    print("KERNEL_OK")
</pallas_src>

<mosaic_0001>
module attributes {stable_mosaic.version = 11 : i64} {
  func.func @_conv_deriv_kernel(%arg0: i32, %arg1: memref<5x16x16xf32, #tpu.memory_space<vmem>>, %arg2: memref<1x16x16xf32, #tpu.memory_space<vmem>>, %arg3: memref<1x16x16xf32, #tpu.memory_space<vmem>>) attributes {dimension_semantics = [#tpu.dimension_semantics<parallel>], iteration_bounds = array<i64: 2>, scalar_prefetch = 0 : i64, scratch_operands = 0 : i64, tpu.core_type = #tpu.core_type<tc>, window_params = [{pipeline_mode = #tpu.pipeline_mode<synchronous>, transform_indices = @transform_0, window_bounds = array<i64: 5, 16, 16>}, {transform_indices = @transform_1, window_bounds = array<i64: 1, 16, 16>}, {transform_indices = @transform_2, window_bounds = array<i64: 1, 16, 16>}]} {
    %c0 = arith.constant 0 : index
    %c0_0 = arith.constant 0 : index
    %c0_1 = arith.constant 0 : index
    %0 = vector.load %arg2[%c0, %c0_0, %c0_1] : memref<1x16x16xf32, #tpu.memory_space<vmem>>, vector<1x16x16xf32>
    %1 = vector.shape_cast %0 : vector<1x16x16xf32> to vector<16x16xf32>
    %c2_i32 = arith.constant 2 : i32
    %2 = tpu.dynamic_rotate %1 by %c2_i32 dim 0 : vector<16x16xf32>, i32 -> vector<16x16xf32>
    %c0_2 = arith.constant 0 : index
    %c0_3 = arith.constant 0 : index
    %c0_4 = arith.constant 0 : index
    %3 = vector.load %arg1[%c0_2, %c0_3, %c0_4] : memref<5x16x16xf32, #tpu.memory_space<vmem>>, vector<1x16x16xf32>
    %4 = vector.shape_cast %3 : vector<1x16x16xf32> to vector<16x16xf32>
    %cst = arith.constant dense<0.000000e+00> : vector<16x16xf32>
    %5 = tpu.matmul %2, %4, %cst {dimension_numbers = #tpu.dot_dimension_numbers<[1], [0], [0], [1], [0, 0, 1, 1], [], []>} : vector<16x16xf32>, vector<16x16xf32>, vector<16x16xf32> -> vector<16x16xf32>
    %c1_i32 = arith.constant 1 : i32
    %6 = tpu.dynamic_rotate %1 by %c1_i32 dim 0 : vector<16x16xf32>, i32 -> vector<16x16xf32>
    %c1 = arith.constant 1 : index
    %c0_5 = arith.constant 0 : index
    %c0_6 = arith.constant 0 : index
    %7 = vector.load %arg1[%c1, %c0_5, %c0_6] : memref<5x16x16xf32, #tpu.memory_space<vmem>>, vector<1x16x16xf32>
    %8 = vector.shape_cast %7 : vector<1x16x16xf32> to vector<16x16xf32>
    %cst_7 = arith.constant dense<0.000000e+00> : vector<16x16xf32>
    %9 = tpu.matmul %6, %8, %cst_7 {dimension_numbers = #tpu.dot_dimension_numbers<[1], [0], [0], [1], [0, 0, 1, 1], [], []>} : vector<16x16xf32>, vector<16x16xf32>, vector<16x16xf32> -> vector<16x16xf32>
    %10 = arith.addf %5, %9 : vector<16x16xf32>
    %c2 = arith.constant 2 : index
    %c0_8 = arith.constant 0 : index
    %c0_9 = arith.constant 0 : index
    %11 = vector.load %arg1[%c2, %c0_8, %c0_9] : memref<5x16x16xf32, #tpu.memory_space<vmem>>, vector<1x16x16xf32>
    %12 = vector.shape_cast %11 : vector<1x16x16xf32> to vector<16x16xf32>
    %cst_10 = arith.constant dense<0.000000e+00> : vector<16x16xf32>
    %13 = tpu.matmul %1, %12, %cst_10 {dimension_numbers = #tpu.dot_dimension_numbers<[1], [0], [0], [1], [0, 0, 1, 1], [], []>} : vector<16x16xf32>, vector<16x16xf32>, vector<16x16xf32> -> vector<16x16xf32>
    %14 = arith.addf %10, %13 : vector<16x16xf32>
    %c15_i32 = arith.constant 15 : i32
    %15 = tpu.dynamic_rotate %1 by %c15_i32 dim 0 : vector<16x16xf32>, i32 -> vector<16x16xf32>
    %c3 = arith.constant 3 : index
    %c0_11 = arith.constant 0 : index
    %c0_12 = arith.constant 0 : index
    %16 = vector.load %arg1[%c3, %c0_11, %c0_12] : memref<5x16x16xf32, #tpu.memory_space<vmem>>, vector<1x16x16xf32>
    %17 = vector.shape_cast %16 : vector<1x16x16xf32> to vector<16x16xf32>
    %cst_13 = arith.constant dense<0.000000e+00> : vector<16x16xf32>
    %18 = tpu.matmul %15, %17, %cst_13 {dimension_numbers = #tpu.dot_dimension_numbers<[1], [0], [0], [1], [0, 0, 1, 1], [], []>} : vector<16x16xf32>, vector<16x16xf32>, vector<16x16xf32> -> vector<16x16xf32>
    %19 = arith.addf %14, %18 : vector<16x16xf32>
    %c14_i32 = arith.constant 14 : i32
    %20 = tpu.dynamic_rotate %1 by %c14_i32 dim 0 : vector<16x16xf32>, i32 -> vector<16x16xf32>
    %c4 = arith.constant 4 : index
    %c0_14 = arith.constant 0 : index
    %c0_15 = arith.constant 0 : index
    %21 = vector.load %arg1[%c4, %c0_14, %c0_15] : memref<5x16x16xf32, #tpu.memory_space<vmem>>, vector<1x16x16xf32>
    %22 = vector.shape_cast %21 : vector<1x16x16xf32> to vector<16x16xf32>
    %cst_16 = arith.constant dense<0.000000e+00> : vector<16x16xf32>
    %23 = tpu.matmul %20, %22, %cst_16 {dimension_numbers = #tpu.dot_dimension_numbers<[1], [0], [0], [1], [0, 0, 1, 1], [], []>} : vector<16x16xf32>, vector<16x16xf32>, vector<16x16xf32> -> vector<16x16xf32>
    %24 = arith.addf %19, %23 : vector<16x16xf32>
    %c0_17 = arith.constant 0 : index
    %c0_18 = arith.constant 0 : index
    %c0_19 = arith.constant 0 : index
    %25 = vector.load %arg3[%c0_17, %c0_18, %c0_19] : memref<1x16x16xf32, #tpu.memory_space<vmem>>, vector<1x16x16xf32>
    %26 = vector.shape_cast %25 : vector<1x16x16xf32> to vector<16x16xf32>
    %27 = vector.shape_cast %24 : vector<16x16xf32> to vector<1x16x16xf32>
    tpu.vector_store %arg3[%c0_17, %c0_18, %c0_19], %27 {strides = array<i32>} : memref<1x16x16xf32, #tpu.memory_space<vmem>>, vector<1x16x16xf32>,
    return
  }
  func.func @transform_0(%arg0: i32) -> (i32, i32, i32) {
    %c0_i32 = arith.constant 0 : i32
    %c0_i32_0 = arith.constant 0 : i32
    %c0_i32_1 = arith.constant 0 : i32
    %c0_i32_2 = arith.constant 0 : i32
    return %c0_i32, %c0_i32_0, %c0_i32_1 : i32, i32, i32
  }
  func.func @transform_1(%arg0: i32) -> (i32, i32, i32) {
    %c0_i32 = arith.constant 0 : i32
    %c0_i32_0 = arith.constant 0 : i32
    %c0_i32_1 = arith.constant 0 : i32
    return %arg0, %c0_i32, %c0_i32_0 : i32, i32, i32
  }
  func.func @transform_2(%arg0: i32) -> (i32, i32, i32) {
    %c0_i32 = arith.constant 0 : i32
    %c0_i32_0 = arith.constant 0 : i32
    %c0_i32_1 = arith.constant 0 : i32
    return %arg0, %c0_i32, %c0_i32_0 : i32, i32, i32
  }
}

module attributes {stable_mosaic.version = 11 : i64} {
  func.func @_conv_deriv_kernel_pmat(%arg0: i32, %arg1: memref<5x16x16xf32, #tpu.memory_space<vmem>>, %arg2: memref<5x16x16xf32, #tpu.memory_space<vmem>>, %arg3: memref<1x16x16xf32, #tpu.memory_space<vmem>>, %arg4: memref<1x16x16xf32, #tpu.memory_space<vmem>>) attributes {dimension_semantics = [#tpu.dimension_semantics<parallel>], iteration_bounds = array<i64: 2>, scalar_prefetch = 0 : i64, scratch_operands = 0 : i64, tpu.core_type = #tpu.core_type<tc>, window_params = [{pipeline_mode = #tpu.pipeline_mode<synchronous>, transform_indices = @transform_0, window_bounds = array<i64: 5, 16, 16>}, {pipeline_mode = #tpu.pipeline_mode<synchronous>, transform_indices = @transform_1, window_bounds = array<i64: 5, 16, 16>}, {transform_indices = @transform_2, window_bounds = array<i64: 1, 16, 16>}, {transform_indices = @transform_3, window_bounds = array<i64: 1, 16, 16>}]} {
    %c0 = arith.constant 0 : index
    %c0_0 = arith.constant 0 : index
    %c0_1 = arith.constant 0 : index
    %0 = vector.load %arg3[%c0, %c0_0, %c0_1] : memref<1x16x16xf32, #tpu.memory_space<vmem>>, vector<1x16x16xf32>
    %1 = vector.shape_cast %0 : vector<1x16x16xf32> to vector<16x16xf32>
    %cst = arith.constant 0.000000e+00 : f32
    %2 = vector.broadcast %cst : f32 to vector<16x16xf32>
    %c0_2 = arith.constant 0 : index
    %c0_3 = arith.constant 0 : index
    %c0_4 = arith.constant 0 : index
    %3 = vector.load %arg1[%c0_2, %c0_3, %c0_4] : memref<5x16x16xf32, #tpu.memory_space<vmem>>, vector<1x16x16xf32>
    %4 = vector.shape_cast %3 : vector<1x16x16xf32> to vector<16x16xf32>
    %cst_5 = arith.constant dense<0.000000e+00> : vector<16x16xf32>
    %5 = tpu.matmul %4, %1, %cst_5 {dimension_numbers = #tpu.dot_dimension_numbers<[1], [0], [0], [1], [0, 0, 1, 1], [], []>} : vector<16x16xf32>, vector<16x16xf32>, vector<16x16xf32> -> vector<16x16xf32>
    %c0_6 = arith.constant 0 : index
    %c0_7 = arith.constant 0 : index
    %c0_8 = arith.constant 0 : index
    %6 = vector.load %arg2[%c0_6, %c0_7, %c0_8] : memref<5x16x16xf32, #tpu.memory_space<vmem>>, vector<1x16x16xf32>
    %7 = vector.shape_cast %6 : vector<1x16x16xf32> to vector<16x16xf32>
    %cst_9 = arith.constant dense<0.000000e+00> : vector<16x16xf32>
    %8 = tpu.matmul %5, %7, %cst_9 {dimension_numbers = #tpu.dot_dimension_numbers<[1], [0], [0], [1], [0, 0, 1, 1], [], []>} : vector<16x16xf32>, vector<16x16xf32>, vector<16x16xf32> -> vector<16x16xf32>
    %9 = arith.addf %2, %8 : vector<16x16xf32>
    %c1 = arith.constant 1 : index
    %c0_10 = arith.constant 0 : index
    %c0_11 = arith.constant 0 : index
    %10 = vector.load %arg1[%c1, %c0_10, %c0_11] : memref<5x16x16xf32, #tpu.memory_space<vmem>>, vector<1x16x16xf32>
    %11 = vector.shape_cast %10 : vector<1x16x16xf32> to vector<16x16xf32>
    %cst_12 = arith.constant dense<0.000000e+00> : vector<16x16xf32>
    %12 = tpu.matmul %11, %1, %cst_12 {dimension_numbers = #tpu.dot_dimension_numbers<[1], [0], [0], [1], [0, 0, 1, 1], [], []>} : vector<16x16xf32>, vector<16x16xf32>, vector<16x16xf32> -> vector<16x16xf32>
    %c1_13 = arith.constant 1 : index
    %c0_14 = arith.constant 0 : index
    %c0_15 = arith.constant 0 : index
    %13 = vector.load %arg2[%c1_13, %c0_14, %c0_15] : memref<5x16x16xf32, #tpu.memory_space<vmem>>, vector<1x16x16xf32>
    %14 = vector.shape_cast %13 : vector<1x16x16xf32> to vector<16x16xf32>
    %cst_16 = arith.constant dense<0.000000e+00> : vector<16x16xf32>
    %15 = tpu.matmul %12, %14, %cst_16 {dimension_numbers = #tpu.dot_dimension_numbers<[1], [0], [0], [1], [0, 0, 1, 1], [], []>} : vector<16x16xf32>, vector<16x16xf32>, vector<16x16xf32> -> vector<16x16xf32>
    %16 = arith.addf %9, %15 : vector<16x16xf32>
    %c2 = arith.constant 2 : index
    %c0_17 = arith.constant 0 : index
    %c0_18 = arith.constant 0 : index
    %17 = vector.load %arg1[%c2, %c0_17, %c0_18] : memref<5x16x16xf32, #tpu.memory_space<vmem>>, vector<1x16x16xf32>
    %18 = vector.shape_cast %17 : vector<1x16x16xf32> to vector<16x16xf32>
    %cst_19 = arith.constant dense<0.000000e+00> : vector<16x16xf32>
    %19 = tpu.matmul %18, %1, %cst_19 {dimension_numbers = #tpu.dot_dimension_numbers<[1], [0], [0], [1], [0, 0, 1, 1], [], []>} : vector<16x16xf32>, vector<16x16xf32>, vector<16x16xf32> -> vector<16x16xf32>
    %c2_20 = arith.constant 2 : index
    %c0_21 = arith.constant 0 : index
    %c0_22 = arith.constant 0 : index
    %20 = vector.load %arg2[%c2_20, %c0_21, %c0_22] : memref<5x16x16xf32, #tpu.memory_space<vmem>>, vector<1x16x16xf32>
    %21 = vector.shape_cast %20 : vector<1x16x16xf32> to vector<16x16xf32>
    %cst_23 = arith.constant dense<0.000000e+00> : vector<16x16xf32>
    %22 = tpu.matmul %19, %21, %cst_23 {dimension_numbers = #tpu.dot_dimension_numbers<[1], [0], [0], [1], [0, 0, 1, 1], [], []>} : vector<16x16xf32>, vector<16x16xf32>, vector<16x16xf32> -> vector<16x16xf32>
    %23 = arith.addf %16, %22 : vector<16x16xf32>
    %c3 = arith.constant 3 : index
    %c0_24 = arith.constant 0 : index
    %c0_25 = arith.constant 0 : index
    %24 = vector.load %arg1[%c3, %c0_24, %c0_25] : memref<5x16x16xf32, #tpu.memory_space<vmem>>, vector<1x16x16xf32>
    %25 = vector.shape_cast %24 : vector<1x16x16xf32> to vector<16x16xf32>
    %cst_26 = arith.constant dense<0.000000e+00> : vector<16x16xf32>
    %26 = tpu.matmul %25, %1, %cst_26 {dimension_numbers = #tpu.dot_dimension_numbers<[1], [0], [0], [1], [0, 0, 1, 1], [], []>} : vector<16x16xf32>, vector<16x16xf32>, vector<16x16xf32> -> vector<16x16xf32>
    %c3_27 = arith.constant 3 : index
    %c0_28 = arith.constant 0 : index
    %c0_29 = arith.constant 0 : index
    %27 = vector.load %arg2[%c3_27, %c0_28, %c0_29] : memref<5x16x16xf32, #tpu.memory_space<vmem>>, vector<1x16x16xf32>
    %28 = vector.shape_cast %27 : vector<1x16x16xf32> to vector<16x16xf32>
    %cst_30 = arith.constant dense<0.000000e+00> : vector<16x16xf32>
    %29 = tpu.matmul %26, %28, %cst_30 {dimension_numbers = #tpu.dot_dimension_numbers<[1], [0], [0], [1], [0, 0, 1, 1], [], []>} : vector<16x16xf32>, vector<16x16xf32>, vector<16x16xf32> -> vector<16x16xf32>
    %30 = arith.addf %23, %29 : vector<16x16xf32>
    %c4 = arith.constant 4 : index
    %c0_31 = arith.constant 0 : index
    %c0_32 = arith.constant 0 : index
    %31 = vector.load %arg1[%c4, %c0_31, %c0_32] : memref<5x16x16xf32, #tpu.memory_space<vmem>>, vector<1x16x16xf32>
    %32 = vector.shape_cast %31 : vector<1x16x16xf32> to vector<16x16xf32>
    %cst_33 = arith.constant dense<0.000000e+00> : vector<16x16xf32>
    %33 = tpu.matmul %32, %1, %cst_33 {dimension_numbers = #tpu.dot_dimension_numbers<[1], [0], [0], [1], [0, 0, 1, 1], [], []>} : vector<16x16xf32>, vector<16x16xf32>, vector<16x16xf32> -> vector<16x16xf32>
    %c4_34 = arith.constant 4 : index
    %c0_35 = arith.constant 0 : index
    %c0_36 = arith.constant 0 : index
    %34 = vector.load %arg2[%c4_34, %c0_35, %c0_36] : memref<5x16x16xf32, #tpu.memory_space<vmem>>, vector<1x16x16xf32>
    %35 = vector.shape_cast %34 : vector<1x16x16xf32> to vector<16x16xf32>
    %cst_37 = arith.constant dense<0.000000e+00> : vector<16x16xf32>
    %36 = tpu.matmul %33, %35, %cst_37 {dimension_numbers = #tpu.dot_dimension_numbers<[1], [0], [0], [1], [0, 0, 1, 1], [], []>} : vector<16x16xf32>, vector<16x16xf32>, vector<16x16xf32> -> vector<16x16xf32>
    %37 = arith.addf %30, %36 : vector<16x16xf32>
    %c0_38 = arith.constant 0 : index
    %c0_39 = arith.constant 0 : index
    %c0_40 = arith.constant 0 : index
    %38 = vector.load %arg4[%c0_38, %c0_39, %c0_40] : memref<1x16x16xf32, #tpu.memory_space<vmem>>, vector<1x16x16xf32>
    %39 = vector.shape_cast %38 : vector<1x16x16xf32> to vector<16x16xf32>
    %40 = vector.shape_cast %37 : vector<16x16xf32> to vector<1x16x16xf32>
    tpu.vector_store %arg4[%c0_38, %c0_39, %c0_40], %40 {strides = array<i32>} : memref<1x16x16xf32, #tpu.memory_space<vmem>>, vector<1x16x16xf32>,
    return
  }
  func.func @transform_0(%arg0: i32) -> (i32, i32, i32) {
    %c0_i32 = arith.constant 0 : i32
    %c0_i32_0 = arith.constant 0 : i32
    %c0_i32_1 = arith.constant 0 : i32
    %c0_i32_2 = arith.constant 0 : i32
    return %c0_i32, %c0_i32_0, %c0_i32_1 : i32, i32, i32
  }
  func.func @transform_1(%arg0: i32) -> (i32, i32, i32) {
    %c0_i32 = arith.constant 0 : i32
    %c0_i32_0 = arith.constant 0 : i32
    %c0_i32_1 = arith.constant 0 : i32
    %c0_i32_2 = arith.constant 0 : i32
    return %c0_i32, %c0_i32_0, %c0_i32_1 : i32, i32, i32
  }
  func.func @transform_2(%arg0: i32) -> (i32, i32, i32) {
    %c0_i32 = arith.constant 0 : i32
    %c0_i32_0 = arith.constant 0 : i32
    %c0_i32_1 = arith.constant 0 : i32
    return %arg0, %c0_i32, %c0_i32_0 : i32, i32, i32
  }
  func.func @transform_3(%arg0: i32) -> (i32, i32, i32) {
    %c0_i32 = arith.constant 0 : i32
    %c0_i32_0 = arith.constant 0 : i32
    %c0_i32_1 = arith.constant 0 : i32
    return %arg0, %c0_i32, %c0_i32_0 : i32, i32, i32
  }
}

</mosaic_0001>

<bundles_post_ra>
// kernel: tpu_custom_call.1
= control target key start
LH: loop header
LB: loop body
LE: loop exit
PB: predicated region body
PF: predicated region fallthrough
CT: control target
= control target key end

     0   :  { %7 = vsyncpa [#allocation3], 0  ;;  %s1281_s0 = inlined_call_operand.hbm [shape: f32[5,16,16], index: 0, kind: input, shape index: {}]   ;;  %s1282_s1 = inlined_call_operand.hbm [shape: f32[2,16,16], index: 1, kind: input, shape index: {}]   ;;  %s1283_s2 = inlined_call_operand.hbm [shape: f32[2,16,16], index: 2, kind: output, shape index: {}]  }
   0x1   :  { %8 = vsyncpa [#allocation6], 0 }
   0x2   :  { %10 = vsyncpa [#allocation6 + $0x1], 0 }
   0x3   :  { %11 = vsyncpa [#allocation4], 0 }
   0x4   :  { %13 = vsyncpa [#allocation4 + $0x1], 0  ;;  %s1052_s9 = smov 0   ;;  %s1054_s10 = smov 0  }
   0x5   :  { %s1056_s11 = smov 0   ;;  %s1058_s12 = smov 0  }
   0x6 LB: > { %s1073_s13 = sadd.s32 4294967295, %s1028_s12   ;;  %s728_s14 = sadd.s32 4294967294, %s1028_s12   ;;  %s1028_s12 = sphi %s1058_s12, %s1303_s12   ;;  %s1024_s11 = sphi %s1056_s11, %s1302_s11   ;;  %s1020_s10 = sphi %s1054_s10, %s1301_s10   ;;  %s1016_s9 = sphi %s1052_s9, %s1300_s9  }
   0x7   : > { %p60_p0 = scmp.ne.s32.totalorder %s1020_s10, %s1016_s9  ;;  %p1284_p1 = scmp.eq.s32.totalorder %s1073_s13, 0 }
   0x8   : > { %p90_p3 = scmp.eq.s32.totalorder %s728_s14, 1  ;;  %p729_p5 = scmp.ge.s32.totalorder %s1028_s12, 1 }
   0x9   : > { %p1082_p4 = por %p1284_p1, %p60_p0  ;;  %p97_p7 = scmp.lt.s32.totalorder %s1028_s12, 3 }
   0xa   : > { %p1087_p6 = por %p90_p3, %p60_p0  ;;  %s1030_s18 = smov [#allocation2]  }
   0xb   : > { %s1287_s15 = scalar_select %p1082_p4, 1, 0 }
   0xc   : > { %s1288_s16 = scalar_select %p1087_p6, 1, 0 }
   0xd   : > { %p1092_p8 = pnand %p729_p5, %p97_p7  ;;  %s109_s19 = sshll.u32 %s1030_s18, 4  ;;  %s1096_s19 = int_to_ptr.vmem [resolvable:$true] %s109_s19 }
   0xe   : > { %s1108_s21 = sadd.s32 1, %s1028_s12   ;;  %s47_s22 = sadd.s32 1, %s1024_s11 }
   0xf   : > { %s1289_s17 = scalar_select %p1092_p8, 1, 0 }
  0x10   : > { %p847_p9 = pneg %p1092_p8  ;;  %s44_s23 = ssub.s32 %s1028_s12, %s1108_s21 }
  0x11   : > { %s900_s26 = scalar_lea.hbm %s1281_s0, 1280 }
  0x12   : > { %p1103_p11 = pnand %p847_p9, %p1284_p1  ;;  %p901_p12 = scmp.ne.s32.totalorder %s1281_s0, %s900_s26 }
  0x13   : > { %p907_p5 = scmp.lt.u32.totalorder %s900_s26, %s1281_s0 }
  0x14   : > { %p902_p13 = pneg %p1103_p11 }
  0x16   : > { %p903_p0 = pnand %p902_p13, %p901_p12 }
  0x18   : > { %p904_p3 = pneg %p903_p0 }
  0x1a   : > { %p909_p7 = pnand %p907_p5, %p904_p3 }
  0x1c   : > { %912 = shalt.err (!%p909_p7)
}
  0x1d   : > { %s913_s3 = scalar_lea.vmem %s1096_s19, 1280  ;;  %p921_p2 = scmp.lt.s32.totalorder %s1096_s19, %s1096_s19 }
  0x1e   : > { %p914_p9 = scmp.ne.s32.totalorder %s1096_s19, %s913_s3  ;;  %p922_p6 = scmp.lt.s32.totalorder %s913_s3, %s913_s3 }
  0x20   : > { %p916_p10 = pnand %p914_p9, %p902_p13  ;;  %p923_p4 = por %p922_p6, %p921_p2 }
  0x22   : > { %p917_p1 = pneg %p916_p10 }
  0x24   : > { %p924_p8 = pnand %p923_p4, %p917_p1 }
  0x26   : > { %927 = shalt.err (!%p924_p8)
}
  0x27   : > { %s1031_s4 = smov 128   ;;  %s1032_s5 = smov 8  }
  0x28   : > { %850 = dma.hbm_to_vmem [thread:$0]  (!%p1103_p11), %s1281_s0, 1280, %s1096_s19, [#allocation3], %s1031_s4, %s1031_s4, %s1032_s5  }
  0x29   : > { %p45_p1 = scmp.eq.s32.totalorder %s44_s23, 0  ;;  %p54_p2 = scmp.ne.s32.totalorder %s1024_s11, %s1020_s10 }
  0x2a   : > { %p55_p4 = scmp.eq.s32.totalorder %s1028_s12, 0  ;;  %p860_p6 = scmp.lt.s32.totalorder %s1028_s12, 2 }
  0x2b   : > { %s1142_s8 = scalar_select %p45_p1, %s1024_s11, %s47_s22  }
  0x2c   : > { %p56_p8 = por %p55_p4, %p54_p2  ;;  %p1291_p10 = scmp.eq.s32.totalorder %s1073_s13, 1 }
  0x2d   : > { %s123_s18 = sand.u32 1, %s1024_s11   ;;  %s754_s20 = sshll.u32 %s1028_s12, 8 }
  0x2e   : > { %p1146_p12 = por %p1291_p10, %p54_p2  ;;  %s732_s24 = sshll.u32 %s123_s18, 4 }
  0x2f   : > { %s1155_s27 = scalar_lea.hbm %s1282_s1, %s754_s20  ;;  %s127_s19 = scalar_lea.vmem [#allocation5], %s732_s24 }
  0x30   : > { %s134_s22 = sshll.u32 %s127_s19, 4  ;;  %p1157_p11 = pnand %p860_p6, %p56_p8  ;;  %s1161_s22 = int_to_ptr.vmem [resolvable:$true] %s134_s22 }
  0x31   : > { %s1163_s28 = scalar_lea.sflag [#allocation6], %s123_s18  ;;  %s928_s29 = scalar_lea.hbm %s1155_s27, 256 }
  0x32   : > { %p929_p13 = scmp.ne.s32.totalorder %s1155_s27, %s928_s29  ;;  %p930_p0 = pneg %p1157_p11 }
  0x33   : > { %s933_s6 = scalar_lea.hbm %s1282_s1, 512  ;;  %p934_p7 = scmp.lt.u32.totalorder %s1155_s27, %s1282_s1 }
  0x34   : > { %p931_p3 = pnand %p930_p0, %p929_p13  ;;  %p935_p9 = scmp.lt.u32.totalorder %s933_s6, %s928_s29 }
  0x35   : > { %p937_p2 = scmp.lt.u32.totalorder %s928_s29, %s1155_s27 }
  0x36   : > { %p932_p5 = pneg %p931_p3  ;;  %p936_p1 = por %p935_p9, %p934_p7 }
  0x38   : > { %p938_p4 = por %p937_p2, %p936_p1 }
  0x3a   : > { %p939_p6 = pnand %p938_p4, %p932_p5 }
  0x3c   : > { %942 = shalt.err (!%p939_p6)
}
  0x3d   : > { %s943_s18 = scalar_lea.vmem %s1161_s22, 256  ;;  %s1033_s24 = smov [#allocation5]  }
  0x3e   : > { %p944_p8 = scmp.ne.s32.totalorder %s1161_s22, %s943_s18  ;;  %s948_s25 = sshll.u32 %s1033_s24, 4  ;;  %s949_s25 = int_to_ptr.vmem [resolvable:$false] %s948_s25 }
  0x3f   : > { %s950_s26 = scalar_lea.vmem %s949_s25, 512  ;;  %p951_p3 = scmp.lt.s32.totalorder %s1161_s22, %s949_s25 }
  0x40   : > { %p946_p10 = pnand %p944_p8, %p930_p0  ;;  %p952_p7 = scmp.lt.s32.totalorder %s950_s26, %s943_s18 }
  0x42   : > { %p947_p13 = pneg %p946_p10  ;;  %p953_p9 = por %p952_p7, %p951_p3 }
  0x44   : > { %p954_p1 = pnand %p953_p9, %p947_p13 }
  0x46   : > { %957 = shalt.err (!%p954_p1)
}
  0x47   : > { %854 = dma.hbm_to_vmem [thread:$0]  (!%p1157_p11), %s1155_s27, 256, %s1161_s22, %s1163_s28, %s1031_s4, %s1031_s4, %s1032_s5  }
  0x48   : > { %p1294_p0 = scmp.ne.s32.totalorder %s1289_s17, 0 }
  0x49   : > { %p1295_p5 = scmp.eq.s32.totalorder (!%p1294_p0), %s1073_s13, 0 }
  0x4a   : > { %146 = sbr.rel (%p1294_p0) target bundleno = 340 (0x154), region = 28 }
  0x51   : > { %1003 = dma.done.wait (%p1295_p5), [#allocation3], 1280   ;;  %p1296_p2 = pmov %p1295_p5 }
  0x52   : > { %s1201_s19 = sand.u32 1, %s1020_s10   ;;  %p1297_p11 = scmp.ne.s32.totalorder %s1287_s15, 0 }
  0x53   : > { %1005 = vsyncadd (%p1296_p2), [#allocation3], 4294966016  ;;  %s737_s23 = sshll.u32 %s1201_s19, 4  ;;  %s153_s29 = scalar_lea.sflag [#allocation6], %s1201_s19 }
  0x54   : > { %s156_s4 = scalar_lea.vmem [#allocation5], %s737_s23 }
  0x55   : > { %1007 = dma.done.wait (%p1297_p11), %s153_s29, 256  }
  0x56   : > { %1009 = vsyncadd (%p1297_p11), %s153_s29, 4294967040  ;;  %v181_v0 = vlaneseq  ;;  %vm196_vm0 = vcmask 130048   ;;  %v194_v2 = vld [vmem:[#allocation2 + $0x10] sm:$0xff]  ;;  %v195_v3 = vld [vmem:[#allocation2 + $0x18] sm:$0xff]  ;;  %s176_s15 = scalar_lea.vmem [#allocation7], %s737_s23  ;;  %s755_s5 = sshll.u32 %s1073_s13, 8 }
  0x57   : > { %v360_v4 = vld [vmem:[#allocation2 + $0x20] sm:$0xff]  ;;  %v811_v5 = vpack.c.bf16 %v195_v3, %v194_v2  ;;  %v361_v6 = vld [vmem:[#allocation2 + $0x28] sm:$0xff]  ;;  %v451_v12 = vld [vmem:[#allocation2 + $0x30] sm:$0xff]  ;;  %s643_s17 = sshll.u32 %s176_s15, 4  ;;  %s1235_s28 = scalar_lea.hbm %s1283_s2, %s755_s5  ;;  %s1230_s17 = int_to_ptr.vmem [resolvable:$true] %s643_s17 }
  0x58   : > { %v182_v1 = vshrl.u32 %v181_v0, 7  ;;  %v177_v7 = vld [vmem:[%s156_s4] sm:$0xff]  ;;  %v178_v8 = vld [vmem:[%s156_s4 + $0x8] sm:$0xff]  ;;  %v819_v9 = vpack.c.bf16 %v361_v6, %v360_v4  ;;  %s630_s30 = scalar_lea.sflag [#allocation4], %s1201_s19  ;;  %s958_s13 = scalar_lea.vmem %s1230_s17, 256 }
  0x59   : > { %v188_v10 = vrot.slane %v177_v7, 7  ;;  %v189_v11 = vrot.slane %v178_v8, 7  ;;  %794 = vmatprep.mubr.msk.f32.mxu0 %vm196_vm0, %v177_v7  ;;  %v452_v13 = vld [vmem:[#allocation2 + $0x38] sm:$0xff]  ;;  %v186_v14 = vld [vmem:[#allocation2] sm:$0xff]  ;;  %v179_v15 = vrot.slane %v177_v7, 6  ;;  %812 = vmatprep.subr.bf16.mxu1 %v811_v5  ;;  %v187_v17 = vld [vmem:[#allocation2 + $0x8] sm:$0xff]  ;;  %p959_p4 = scmp.ne.s32.totalorder %s1230_s17, %s958_s13 }
  0x5a   : > { %vm190_vm1 = vcmp.lt.s32.totalorder %v182_v1, 1  ;;  %vm183_vm2 = vcmp.lt.s32.totalorder %v182_v1, 2  ;;  %v823_v16 = vpack.c.bf16 %v452_v13, %v451_v12  ;;  %v180_v18 = vrot.slane %v178_v8, 6  ;;  %v542_v21 = vld [vmem:[#allocation2 + $0x40] sm:$0xff]  ;;  %v543_v22 = vld [vmem:[#allocation2 + $0x48] sm:$0xff]  ;;  %820 = vmatprep.subr.bf16.mxu0 %v819_v9  ;;  %814 = vmatpush3.bf16.msra.mxu1 %v811_v5  ;;  %s1034_s3 = smov [#allocation7]  }
  0x5b   : > { %v445_v19 = vrot.slane %v177_v7, 1  ;;  %v446_v20 = vrot.slane %v178_v8, 1  ;;  %v192_v23 = vsel %vm190_vm1, %v189_v11, %v188_v10  ;;  %v191_v24 = vsel %vm190_vm1, %v188_v10, %v189_v11  ;;  %822 = vmatpush3.bf16.msra.mxu0 %v819_v9  ;;  %p960_p6 = pnand %p959_p4, %p1146_p12  ;;  %s962_s6 = sshll.u32 %s1034_s3, 4  ;;  %s963_s6 = int_to_ptr.vmem [resolvable:$false] %s962_s6 }
  0x5c   : > { %v815_v25 = vpack.c.bf16 %v187_v17, %v186_v14  ;;  %vm447_vm3 = vcmp.lt.s32.totalorder %v182_v1, 7  ;;  %780 = vmatprep.mubr.msk.f32.mxu1 %vm196_vm0, %v192_v23  ;;  %824 = vmatprep.subr.bf16.mxu0 %v823_v16  ;;  %v185_v26 = vsel %vm183_vm2, %v180_v18, %v179_v15  ;;  %v827_v27 = vpack.c.bf16 %v543_v22, %v542_v21  ;;  %s964_s7 = scalar_lea.vmem %s963_s6, 512  ;;  %p965_p10 = scmp.lt.s32.totalorder %s1230_s17, %s963_s6 }
  0x5d   : > { %781 = vmatmul.mubr.msk.f32.vlgmr.msra.gmra.mrb[0].mxu1 %vm196_vm0, %v191_v24  ;;  %v448_v28 = vsel %vm447_vm3, %v445_v19, %v446_v20  ;;  %v536_v29 = vrot.slane %v177_v7, 2  ;;  %v537_v30 = vrot.slane %v178_v8, 2  ;;  %vm538_vm4 = vcmp.lt.s32.totalorder %v182_v1, 6  ;;  %p961_p8 = pneg %p960_p6  ;;  %p966_p13 = scmp.lt.s32.totalorder %s964_s7, %s958_s13 }
  0x5e   : > { %816 = vmatprep.subr.bf16.mxu1 %v815_v25  ;;  %795 = vmatmul.mubr.msk.f32.vlgmr.msra.gmra.mrb[0].mxu0 %vm196_vm0, %v178_v8  ;;  %v184_v31 = vsel %vm183_vm2, %v179_v15, %v180_v18  ;;  %v449_v32 = vsel %vm447_vm3, %v446_v20, %v445_v19 }
  0x5f   : > { %818 = vmatpush3.bf16.msra.mxu1 %v815_v25  ;;  %826 = vmatpush3.bf16.msra.mxu0 %v823_v16  ;;  %v539_v33 = vsel %vm538_vm4, %v536_v29, %v537_v30  ;;  %v540_v34 = vsel %vm538_vm4, %v537_v30, %v536_v29  ;;  %p967_p3 = por %p966_p13, %p965_p10 }
  0x60   : > { %787 = vmatprep.mubr.msk.f32.mxu1 %vm196_vm0, %v185_v26  ;;  %801 = vmatprep.mubr.msk.f32.mxu0 %vm196_vm0, %v448_v28 }
  0x61   : > { %828 = vmatprep.subr.bf16.mxu0 %v827_v27  ;;  %p968_p7 = pnand %p967_p3, %p961_p8 }
  0x65   : > { %788 = vmatmul.mubr.msk.f32.vlgmr.msra.gmra.mrb[0].mxu1 %vm196_vm0, %v184_v31 }
  0x66   : > { %802 = vmatmul.mubr.msk.f32.vlgmr.msra.gmra.mrb[0].mxu0 %vm196_vm0, %v449_v32 }
  0x67   : > { %830 = vmatpush3.bf16.msra.mxu0 %v827_v27  ;;  %808 = vmatprep.mubr.msk.f32.mxu0 %vm196_vm0, %v539_v33 }
  0x6e   : > { %809 = vmatmul.mubr.msk.f32.vlgmr.msra.gmra.mrb[0].mxu0 %vm196_vm0, %v540_v34 }
 0x138   : > { %v789_v35 = vpop.f32.mrb[0].mxu1 }
 0x139   : > { %v350_v36 = vpop.f32.mrb[1].mxu1 }
 0x141   : > { %v810_v37 = vpop.f32.mrb[0].mxu0 }
 0x142   : > { %v831_v38 = vadd.f32 %v810_v37, %v789_v35  ;;  %v616_v39 = vpop.f32.mrb[1].mxu0 }
 0x143   : > { %v832_v40 = vadd.f32 %v616_v39, %v350_v36 }
 0x144   : > { %628 = vst.msk [vmem:[%s176_s15 + $0x8] sm:$0xff] %vm196_vm0, %v831_v38 }
 0x145   : > { %627 = vst.msk [vmem:[%s176_s15] sm:$0xff] %vm196_vm0, %v832_v40 }
 0x146   : > { %971 = shalt.err (!%p968_p7)
}
 0x147   : > { %s972_s20 = scalar_lea.hbm %s1235_s28, 256  ;;  %s976_s25 = scalar_lea.hbm %s1283_s2, 512 }
 0x148   : > { %p973_p9 = scmp.ne.s32.totalorder %s1235_s28, %s972_s20  ;;  %p977_p5 = scmp.lt.u32.totalorder %s1235_s28, %s1283_s2 }
 0x149   : > { %p978_p2 = scmp.lt.u32.totalorder %s976_s25, %s972_s20  ;;  %p980_p4 = scmp.lt.u32.totalorder %s972_s20, %s1235_s28 }
 0x14a   : > { %p974_p1 = pnand %p973_p9, %p1146_p12 }
 0x14b   : > { %p979_p11 = por %p978_p2, %p977_p5 }
 0x14c   : > { %p975_p0 = pneg %p974_p1 }
 0x14d   : > { %p981_p6 = por %p980_p4, %p979_p11 }
 0x14f   : > { %p982_p8 = pnand %p981_p6, %p975_p0 }
 0x151   : > { %985 = shalt.err (!%p982_p8)
}
 0x152   : > { %s1035_s29 = smov 128   ;;  %s1036_s4 = smov 8  }
 0x153   : > { %845 = dma.vmem_to_hbm [thread:$0]  (%p1146_p12), %s1230_s17, 256, %s1235_s28, %s630_s30, %s1035_s29, %s1035_s29, %s1036_s4  }
 0x154 PF: > { %s658_s15 = sand.u32 1, %s1016_s9   ;;  %p1298_p10 = scmp.ne.s32.totalorder %s1288_s16, 0 }
 0x155   : > { %p1299_p13 = scmp.ge.s32.totalorder %s1028_s12, 2  ;;  %s659_s5 = scalar_lea.sflag [#allocation4], %s658_s15 }
 0x157   : > { %p856_p3 = pnand %p1299_p13, %p1298_p10 }
 0x159   : > { %1011 = dma.done.wait (!%p856_p3), %s659_s5, 256  }
 0x15a   : > { %1013 = vsyncadd (!%p856_p3), %s659_s5, 4294967040  ;;  %p16_p7 = scmp.ge.s32.totalorder %s1108_s21, 4   ;;  %s1300_s9 = smov %s1020_s10 }
 0x15b   : > { %s1301_s10 = smov %s1024_s11  ;;  %s1302_s11 = smov %s1142_s8 }
 0x15c   : > { %s1303_s12 = smov %s1108_s21  ;;  %18 = sbr.rel (!%p16_p7) target bundleno = 6 (0x6), region = 82 }
 0x163   :  { %664 = vsyncpa [#allocation3], 1 }
 0x164   :  { %666 = vsyncpa [#allocation3 + $0x1], 1 }
 0x165   :  { %667 = vsyncpa [#allocation6], 1 }
 0x166   :  { %669 = vsyncpa [#allocation6 + $0x1], 1 }
 0x167   :  { %670 = vsyncpa [#allocation4], 1 }
 0x168   :  { %672 = vsyncpa [#allocation4 + $0x1], 1 }

// kernel: tpu_custom_call.1
= control target key start
LH: loop header
LB: loop body
LE: loop exit
PB: predicated region body
PF: predicated region fallthrough
CT: control target
= control target key end

     0   :  { %8 = vsyncpa [#allocation3], 0  ;;  %s1897_s0 = inlined_call_operand.hbm [shape: f32[5,16,16], index: 0, kind: input, shape index: {}]   ;;  %s1898_s1 = inlined_call_operand.hbm [shape: f32[5,16,16], index: 1, kind: input, shape index: {}]   ;;  %s1899_s2 = inlined_call_operand.hbm [shape: f32[2,16,16], index: 2, kind: input, shape index: {}]   ;;  %s1900_s3 = inlined_call_operand.hbm [shape: f32[2,16,16], index: 3, kind: output, shape index: {}]  }
   0x1   :  { %9 = vsyncpa [#allocation6], 0 }
   0x2   :  { %10 = vsyncpa [#allocation4], 0 }
   0x3   :  { %12 = vsyncpa [#allocation4 + $0x1], 0  ;;  %s1630_s12 = smov 0   ;;  %s1632_s13 = smov 0  }
   0x4   :  { %s1634_s14 = smov 0   ;;  %s1636_s15 = smov 0  }
   0x5 LB: > { %s1651_s16 = sadd.s32 4294967295, %s1600_s15   ;;  %s1171_s17 = sadd.s32 4294967294, %s1600_s15   ;;  %s1600_s15 = sphi %s1636_s15, %s1928_s15   ;;  %s1596_s14 = sphi %s1634_s14, %s1927_s14   ;;  %s1592_s13 = sphi %s1632_s13, %s1926_s13   ;;  %s1588_s12 = sphi %s1630_s12, %s1925_s12  }
   0x6   : > { %s1655_s18 = sadd.s32 1, %s1600_s15   ;;  %s67_s19 = sadd.s32 1, %s1596_s14 }
   0x7   : > { %s64_s20 = ssub.s32 %s1600_s15, %s1655_s18  ;;  %p74_p0 = scmp.ne.s32.totalorder %s1596_s14, %s1592_s13 }
   0x8   : > { %p65_p1 = scmp.eq.s32.totalorder %s64_s20, 0  ;;  %p75_p2 = scmp.eq.s32.totalorder %s1600_s15, 0 }
   0x9   : > { %p80_p3 = scmp.ne.s32.totalorder %s1592_s13, %s1588_s12  ;;  %p1901_p4 = scmp.eq.s32.totalorder %s1651_s16, 0 }
   0xa   : > { %s1667_s21 = scalar_select %p65_p1, %s1596_s14, %s67_s19  }
   0xb   : > { %p1669_p5 = por %p75_p2, %p74_p0  ;;  %p1675_p6 = por %p1901_p4, %p80_p3 }
   0xc   : > { %p104_p7 = scmp.eq.s32.totalorder %s1651_s16, 1  ;;  %p110_p8 = scmp.eq.s32.totalorder %s1171_s17, 1 }
   0xd   : > { %s1906_s22 = scalar_select %p1669_p5, 1, 0 }
   0xe   : > { %s1907_s23 = scalar_select %p1675_p6, 1, 0 }
   0xf   : > { %p1172_p9 = scmp.ge.s32.totalorder %s1600_s15, 1  ;;  %p117_p10 = scmp.lt.s32.totalorder %s1600_s15, 3 }
  0x10   : > { %p1682_p11 = por %p104_p7, %p74_p0  ;;  %p1686_p12 = por %p110_p8, %p80_p3 }
  0x11   : > { %p1690_p13 = pnand %p1172_p9, %p117_p10  ;;  %s1602_s27 = smov [#allocation2]  }
  0x12   : > { %s1908_s24 = scalar_select %p1682_p11, 1, 0 }
  0x13   : > { %s1909_s25 = scalar_select %p1686_p12, 1, 0 }
  0x14   : > { %s1910_s26 = scalar_select %p1690_p13, 1, 0 }
  0x15   : > { %p1381_p1 = pneg %p1690_p13  ;;  %s129_s28 = sshll.u32 %s1602_s27, 4  ;;  %s130_s28 = int_to_ptr.vmem [resolvable:$true] %s129_s28 }
  0x16   : > { %s1603_s30 = smov [#allocation5]   ;;  %s1440_s7 = scalar_lea.hbm %s1897_s0, 1280 }
  0x17   : > { %p1698_p2 = pnand %p1381_p1, %p1901_p4  ;;  %s142_s4 = sshll.u32 %s1603_s30, 4  ;;  %s143_s4 = int_to_ptr.vmem [resolvable:$true] %s142_s4 }
  0x18   : > { %p1441_p7 = scmp.ne.s32.totalorder %s1897_s0, %s1440_s7  ;;  %p1447_p1 = scmp.lt.u32.totalorder %s1440_s7, %s1897_s0 }
  0x19   : > { %p1442_p8 = pneg %p1698_p2 }
  0x1b   : > { %p1443_p9 = pnand %p1442_p8, %p1441_p7 }
  0x1d   : > { %p1444_p10 = pneg %p1443_p9 }
  0x1f   : > { %p1449_p0 = pnand %p1447_p1, %p1444_p10 }
  0x21   : > { %1452 = shalt.err (!%p1449_p0)
}
  0x22   : > { %s1453_s17 = scalar_lea.vmem %s130_s28, 1280  ;;  %p1461_p11 = scmp.lt.s32.totalorder %s130_s28, %s130_s28 }
  0x23   : > { %p1454_p4 = scmp.ne.s32.totalorder %s130_s28, %s1453_s17  ;;  %p1462_p6 = scmp.lt.s32.totalorder %s1453_s17, %s1453_s17 }
  0x25   : > { %p1456_p3 = pnand %p1454_p4, %p1442_p8  ;;  %p1463_p13 = por %p1462_p6, %p1461_p11 }
  0x27   : > { %p1457_p12 = pneg %p1456_p3 }
  0x29   : > { %p1464_p5 = pnand %p1463_p13, %p1457_p12 }
  0x2b   : > { %1467 = shalt.err (!%p1464_p5)
}
  0x2c   : > { %s1604_s19 = smov 128   ;;  %s1605_s20 = smov 8  }
  0x2d   : > { %1384 = dma.hbm_to_vmem [thread:$0]  (!%p1698_p2), %s1897_s0, 1280, %s130_s28, [#allocation3], %s1604_s19, %s1604_s19, %s1605_s20  }
  0x2e   : > { %p1912_p4 = scmp.ne.s32.totalorder %s1906_s22, 0  ;;  %p1913_p0 = scmp.lt.s32.totalorder %s1600_s15, 2 }
  0x2f   : > { %s1468_s8 = scalar_lea.hbm %s1898_s1, 1280 }
  0x30   : > { %p1733_p3 = pnand %p1913_p0, %p1912_p4  ;;  %p1469_p5 = scmp.ne.s32.totalorder %s1898_s1, %s1468_s8 }
  0x31   : > { %p1475_p12 = scmp.lt.u32.totalorder %s1468_s8, %s1898_s1 }
  0x32   : > { %s1914_s5 = scalar_select %p1733_p3, 1, 0 }
  0x33   : > { %p1471_p6 = pnand %p1469_p5, %p1442_p8 }
  0x35   : > { %p1472_p11 = pneg %p1471_p6 }
  0x37   : > { %p1477_p13 = pnand %p1475_p12, %p1472_p11 }
  0x39   : > { %1480 = shalt.err (!%p1477_p13)
}
  0x3a   : > { %s1481_s11 = scalar_lea.vmem %s143_s4, 1280  ;;  %p1489_p1 = scmp.lt.s32.totalorder %s143_s4, %s143_s4 }
  0x3b   : > { %p1482_p7 = scmp.ne.s32.totalorder %s143_s4, %s1481_s11  ;;  %p1490_p4 = scmp.lt.s32.totalorder %s1481_s11, %s1481_s11 }
  0x3d   : > { %p1484_p9 = pnand %p1482_p7, %p1442_p8  ;;  %p1491_p0 = por %p1490_p4, %p1489_p1 }
  0x3f   : > { %p1485_p10 = pneg %p1484_p9 }
  0x41   : > { %p1492_p3 = pnand %p1491_p0, %p1485_p10 }
  0x43   : > { %1495 = shalt.err (!%p1492_p3)
}
  0x44   : > { %1387 = dma.hbm_to_vmem [thread:$0]  (!%p1698_p2), %s1898_s1, 1280, %s143_s4, [#allocation6], %s1604_s19, %s1604_s19, %s1605_s20  }
  0x45   : > { %s156_s30 = sand.u32 1, %s1600_s15   ;;  %s158_s6 = sand.u32 1, %s1596_s14  }
  0x46   : > { %s1176_s7 = sshll.u32 %s158_s6, 4  ;;  %s1209_s8 = sshll.u32 %s1600_s15, 8 }
  0x47   : > { %s1766_s29 = scalar_lea.hbm %s1899_s2, %s1209_s8  ;;  %s160_s28 = scalar_lea.vmem [#allocation7], %s1176_s7 }
  0x48   : > { %s167_s22 = sshll.u32 %s160_s28, 4  ;;  %s1770_s11 = scalar_lea.sflag [#allocation3], %s156_s30  ;;  %s1768_s22 = int_to_ptr.vmem [resolvable:$true] %s167_s22 }
  0x49   : > { %s1496_s4 = scalar_lea.hbm %s1766_s29, 256  ;;  %p1915_p8 = scmp.ne.s32.totalorder %s1914_s5, 0 }
  0x4a   : > { %p1497_p2 = scmp.ne.s32.totalorder %s1766_s29, %s1496_s4  ;;  %s1501_s6 = scalar_lea.hbm %s1899_s2, 512 }
  0x4b   : > { %p1498_p3 = pneg %p1915_p8  ;;  %p1502_p11 = scmp.lt.u32.totalorder %s1766_s29, %s1899_s2 }
  0x4c   : > { %p1503_p12 = scmp.lt.u32.totalorder %s1501_s6, %s1496_s4  ;;  %p1505_p7 = scmp.lt.u32.totalorder %s1496_s4, %s1766_s29 }
  0x4d   : > { %p1499_p5 = pnand %p1498_p3, %p1497_p2 }
  0x4e   : > { %p1504_p13 = por %p1503_p12, %p1502_p11 }
  0x4f   : > { %p1500_p6 = pneg %p1499_p5 }
  0x50   : > { %p1506_p9 = por %p1505_p7, %p1504_p13 }
  0x52   : > { %p1507_p10 = pnand %p1506_p9, %p1500_p6 }
  0x54   : > { %1510 = shalt.err (!%p1507_p10)
}
  0x55   : > { %s1511_s30 = scalar_lea.vmem %s1768_s22, 256  ;;  %s1606_s7 = smov [#allocation7]  }
  0x56   : > { %p1512_p1 = scmp.ne.s32.totalorder %s1768_s22, %s1511_s30  ;;  %s1516_s10 = sshll.u32 %s1606_s7, 4  ;;  %s1517_s10 = int_to_ptr.vmem [resolvable:$false] %s1516_s10 }
  0x57   : > { %s1518_s28 = scalar_lea.vmem %s1517_s10, 512  ;;  %p1519_p2 = scmp.lt.s32.totalorder %s1768_s22, %s1517_s10 }
  0x58   : > { %p1514_p4 = pnand %p1512_p1, %p1498_p3  ;;  %p1520_p5 = scmp.lt.s32.totalorder %s1518_s28, %s1511_s30 }
  0x5a   : > { %p1515_p0 = pneg %p1514_p4  ;;  %p1521_p11 = por %p1520_p5, %p1519_p2 }
  0x5c   : > { %p1522_p12 = pnand %p1521_p11, %p1515_p0 }
  0x5e   : > { %1525 = shalt.err (!%p1522_p12)
}
  0x5f   : > { %1391 = dma.hbm_to_vmem [thread:$0]  (!%p1915_p8), %s1766_s29, 256, %s1768_s22, %s1770_s11, %s1604_s19, %s1604_s19, %s1605_s20  }
  0x60   : > { %p1916_p3 = scmp.ne.s32.totalorder %s1910_s26, 0 }
  0x61   : > { %p1917_p6 = scmp.eq.s32.totalorder (!%p1916_p3), %s1651_s16, 0 }
  0x62   : > { %179 = sbr.rel (%p1916_p3) target bundleno = 599 (0x257), region = 32 }
  0x69   : > { %1571 = dma.done.wait (%p1917_p6), [#allocation3], 1280   ;;  %p1918_p13 = pmov %p1917_p6 }
  0x6a   : > { %p1919_p7 = pmov %p1917_p6 }
  0x6b   : > { %1573 = vsyncadd (%p1918_p13), [#allocation3], 4294966016 }
  0x6c   : > { %1575 = dma.done.wait (%p1919_p7), [#allocation6], 1280   ;;  %p1920_p9 = pmov %p1917_p6 }
  0x6d   : > { %s189_s19 = sand.u32 1, %s1651_s16   ;;  %s191_s20 = sand.u32 1, %s1592_s13  }
  0x6e   : > { %1577 = vsyncadd (%p1920_p9), [#allocation6], 4294966016  ;;  %s1815_s26 = sshll.u32 %s191_s20, 4  ;;  %s190_s5 = scalar_lea.sflag [#allocation3], %s189_s19 }
  0x6f   : > { %s193_s29 = scalar_lea.vmem [#allocation7], %s1815_s26  ;;  %p1921_p8 = scmp.ne.s32.totalorder %s1907_s23, 0 }
  0x71   : > { %1579 = dma.done.wait (%p1921_p8), %s190_s5, 256  }
  0x72   : > { %1581 = vsyncadd (%p1921_p8), %s190_s5, 4294967040  ;;  %vm220_vm0 = vcmask 130048   ;;  %v216_v0 = vld [vmem:[%s193_s29] sm:$0xff]  ;;  %v217_v1 = vld [vmem:[%s193_s29 + $0x8] sm:$0xff]  ;;  %s215_s23 = scalar_lea.vmem [#allocation8], %s1815_s26  ;;  %s1210_s11 = sshll.u32 %s1651_s16, 8 }
  0x73   : > { %v218_v2 = vld [vmem:[#allocation2] sm:$0xff]  ;;  %v1321_v3 = vpack.c.bf16 %v217_v1, %v216_v0  ;;  %v219_v4 = vld [vmem:[#allocation2 + $0x8] sm:$0xff]  ;;  %v305_v5 = vld [vmem:[#allocation2 + $0x10] sm:$0xff]  ;;  %s1079_s22 = sshll.u32 %s215_s23, 4  ;;  %s1849_s27 = scalar_lea.hbm %s1900_s3, %s1210_s11  ;;  %s1844_s22 = int_to_ptr.vmem [resolvable:$true] %s1079_s22 }
  0x74   : > { %1255 = vmatprep.mubr.msk.f32.mxu1 %vm220_vm0, %v218_v2  ;;  %v306_v6 = vld [vmem:[#allocation2 + $0x18] sm:$0xff]  ;;  %v554_v7 = vld [vmem:[#allocation2 + $0x20] sm:$0xff]  ;;  %v555_v8 = vld [vmem:[#allocation2 + $0x28] sm:$0xff]  ;;  %s1855_s6 = scalar_lea.sflag [#allocation4], %s191_s20  ;;  %s1526_s16 = scalar_lea.vmem %s1844_s22, 256 }
  0x75   : > { %1322 = vmatprep.subr.bf16.mxu1 %v1321_v3  ;;  %v724_v9 = vld [vmem:[#allocation2 + $0x30] sm:$0xff]  ;;  %v725_v10 = vld [vmem:[#allocation2 + $0x38] sm:$0xff]  ;;  %v894_v11 = vld [vmem:[#allocation2 + $0x40] sm:$0xff]  ;;  %p1527_p10 = scmp.ne.s32.totalorder %s1844_s22, %s1526_s16  ;;  %p1922_p1 = scmp.ne.s32.totalorder %s1908_s24, 0 }
  0x76   : > { %1324 = vmatpush3.bf16.msra.mxu1 %v1321_v3  ;;  %v895_v12 = vld [vmem:[#allocation2 + $0x48] sm:$0xff]  ;;  %v389_v13 = vld [vmem:[#allocation5 + $0x10] sm:$0xff]  ;;  %v302_v16 = vld [vmem:[#allocation5] sm:$0xff]  ;;  %s1607_s8 = smov [#allocation8]  }
  0x77   : > { %1326 = vmatprep.subr.bf16.mxu1 %v1321_v3  ;;  %v390_v14 = vld [vmem:[#allocation5 + $0x18] sm:$0xff]  ;;  %v303_v17 = vld [vmem:[#allocation5 + $0x8] sm:$0xff]  ;;  %v638_v21 = vld [vmem:[#allocation5 + $0x20] sm:$0xff]  ;;  %p1528_p4 = pnand %p1527_p10, %p1922_p1  ;;  %s1530_s9 = sshll.u32 %s1607_s8, 4  ;;  %s1531_s9 = int_to_ptr.vmem [resolvable:$false] %s1530_s9 }
  0x78   : > { %v1329_v15 = vpack.c.bf16 %v390_v14, %v389_v13  ;;  %v1333_v18 = vpack.c.bf16 %v303_v17, %v302_v16  ;;  %v639_v22 = vld [vmem:[#allocation5 + $0x28] sm:$0xff]  ;;  %v808_v28 = vld [vmem:[#allocation5 + $0x30] sm:$0xff]  ;;  %v809_v29 = vld [vmem:[#allocation5 + $0x38] sm:$0xff]  ;;  %s1532_s30 = scalar_lea.vmem %s1531_s9, 512  ;;  %p1533_p2 = scmp.lt.s32.totalorder %s1844_s22, %s1531_s9 }
  0x79   : > { %1256 = vmatmul.mubr.msk.f32.vlgmr.msra.gmra.mrb[0].mxu1 %vm220_vm0, %v219_v4  ;;  %v1341_v25 = vpack.c.bf16 %v639_v22, %v638_v21  ;;  %v1349_v31 = vpack.c.bf16 %v809_v29, %v808_v28  ;;  %v978_v35 = vld [vmem:[#allocation5 + $0x40] sm:$0xff]  ;;  %v979_v36 = vld [vmem:[#allocation5 + $0x48] sm:$0xff]  ;;  %p1529_p0 = pneg %p1528_p4  ;;  %p1534_p5 = scmp.lt.s32.totalorder %s1532_s30, %s1526_s16 }
  0x7a   : > { %1328 = vmatpush3.bf16.msra.mxu1 %v1321_v3  ;;  %1262 = vmatprep.mubr.msk.f32.mxu1 %vm220_vm0, %v305_v5  ;;  %v1357_v37 = vpack.c.bf16 %v979_v36, %v978_v35 }
  0x7b   : > { %1338 = vmatprep.subr.bf16.mxu1 %v1321_v3  ;;  %1330 = vmatprep.subr.bf16.mxu0 %v1329_v15  ;;  %p1535_p11 = por %p1534_p5, %p1533_p2 }
  0x7c   : > { %1332 = vmatpush3.bf16.msra.mxu0 %v1329_v15 }
  0x7d   : > { %1263 = vmatmul.mubr.msk.f32.vlgmr.msra.gmra.mrb[2].mxu1 %vm220_vm0, %v306_v6  ;;  %1334 = vmatprep.subr.bf16.mxu0 %v1333_v18  ;;  %p1536_p12 = pnand %p1535_p11, %p1529_p0 }
  0x7e   : > { %1340 = vmatpush3.bf16.msra.mxu1 %v1321_v3  ;;  %1283 = vmatprep.mubr.msk.f32.mxu1 %vm220_vm0, %v554_v7 }
  0x7f   : > { %1346 = vmatprep.subr.bf16.mxu1 %v1321_v3 }
  0x81   : > { %1284 = vmatmul.mubr.msk.f32.vlgmr.msra.gmra.mrb[4].mxu1 %vm220_vm0, %v555_v8 }
  0x82   : > { %1348 = vmatpush3.bf16.msra.mxu1 %v1321_v3  ;;  %1297 = vmatprep.mubr.msk.f32.mxu1 %vm220_vm0, %v724_v9 }
  0x83   : > { %1354 = vmatprep.subr.bf16.mxu1 %v1321_v3 }
  0x85   : > { %1298 = vmatmul.mubr.msk.f32.vlgmr.msra.gmra.mrb[6].mxu1 %vm220_vm0, %v725_v10 }
  0x86   : > { %1356 = vmatpush3.bf16.msra.mxu1 %v1321_v3  ;;  %1311 = vmatprep.mubr.msk.f32.mxu1 %vm220_vm0, %v894_v11 }
  0x89   : > { %1312 = vmatmul.mubr.msk.f32.vlgmr.msra.gmra.mrb[8].mxu1 %vm220_vm0, %v895_v12 }
 0x14c   : > { %v1257_v19 = vpop.f32.mrb[0].mxu1 }
 0x14d   : > { %v293_v20 = vpop.f32.mrb[1].mxu1 }
 0x150   : > { %v1264_v23 = vpop.f32.mrb[2].mxu1 }
 0x151   : > { %v379_v24 = vpop.f32.mrb[3].mxu1 }
 0x152   : > { %1269 = vmatprep.mubr.msk.f32.mxu0 %vm220_vm0, %v379_v24 }
 0x153   : > { %1270 = vmatmul.mubr.msk.f32.vlgmr.msra.gmra.mrb[0].mxu0 %vm220_vm0, %v1264_v23 }
 0x154   : > { %1336 = vmatpush3.bf16.msra.mxu0 %v1333_v18  ;;  %1276 = vmatprep.mubr.msk.f32.mxu0 %vm220_vm0, %v293_v20  ;;  %v1285_v26 = vpop.f32.mrb[4].mxu1 }
 0x155   : > { %1342 = vmatprep.subr.bf16.mxu0 %v1341_v25  ;;  %v628_v27 = vpop.f32.mrb[5].mxu1 }
 0x158   : > { %v1299_v30 = vpop.f32.mrb[6].mxu1 }
 0x159   : > { %v798_v32 = vpop.f32.mrb[7].mxu1 }
 0x15b   : > { %1277 = vmatmul.mubr.msk.f32.vlgmr.msra.gmra.mrb[0].mxu0 %vm220_vm0, %v1257_v19 }
 0x15c   : > { %1344 = vmatpush3.bf16.msra.mxu0 %v1341_v25  ;;  %1290 = vmatprep.mubr.msk.f32.mxu0 %vm220_vm0, %v628_v27  ;;  %v1313_v33 = vpop.f32.mrb[8].mxu1 }
 0x15d   : > { %1350 = vmatprep.subr.bf16.mxu0 %v1349_v31  ;;  %v968_v34 = vpop.f32.mrb[9].mxu1 }
 0x163   : > { %1291 = vmatmul.mubr.msk.f32.vlgmr.msra.gmra.mrb[0].mxu0 %vm220_vm0, %v1285_v26 }
 0x164   : > { %1352 = vmatpush3.bf16.msra.mxu0 %v1349_v31  ;;  %1304 = vmatprep.mubr.msk.f32.mxu0 %vm220_vm0, %v798_v32 }
 0x165   : > { %1358 = vmatprep.subr.bf16.mxu0 %v1357_v37 }
 0x16b   : > { %1305 = vmatmul.mubr.msk.f32.vlgmr.msra.gmra.mrb[0].mxu0 %vm220_vm0, %v1299_v30 }
 0x16c   : > { %1360 = vmatpush3.bf16.msra.mxu0 %v1357_v37  ;;  %1318 = vmatprep.mubr.msk.f32.mxu0 %vm220_vm0, %v968_v34 }
 0x173   : > { %1319 = vmatmul.mubr.msk.f32.vlgmr.msra.gmra.mrb[0].mxu0 %vm220_vm0, %v1313_v33 }
 0x246   : > { %v1320_v38 = vpop.f32.mrb[0].mxu0 }
 0x247   : > { %1064 = vst.msk [vmem:[%s215_s23 + $0x8] sm:$0xff] %vm220_vm0, %v1320_v38  ;;  %v1052_v39 = vpop.f32.mrb[1].mxu0 }
 0x248   : > { %1063 = vst.msk [vmem:[%s215_s23] sm:$0xff] %vm220_vm0, %v1052_v39 }
 0x249   : > { %1539 = shalt.err (!%p1536_p12)
}
 0x24a   : > { %s1540_s7 = scalar_lea.hbm %s1849_s27, 256  ;;  %s1544_s19 = scalar_lea.hbm %s1900_s3, 512 }
 0x24b   : > { %p1541_p3 = scmp.ne.s32.totalorder %s1849_s27, %s1540_s7  ;;  %p1545_p7 = scmp.lt.u32.totalorder %s1849_s27, %s1900_s3 }
 0x24c   : > { %p1546_p9 = scmp.lt.u32.totalorder %s1544_s19, %s1540_s7  ;;  %p1548_p10 = scmp.lt.u32.totalorder %s1540_s7, %s1849_s27 }
 0x24d   : > { %p1542_p6 = pnand %p1541_p3, %p1922_p1 }
 0x24e   : > { %p1547_p8 = por %p1546_p9, %p1545_p7 }
 0x24f   : > { %p1543_p13 = pneg %p1542_p6 }
 0x250   : > { %p1549_p4 = por %p1548_p10, %p1547_p8 }
 0x252   : > { %p1550_p0 = pnand %p1549_p4, %p1543_p13 }
 0x254   : > { %1553 = shalt.err (!%p1550_p0)
}
 0x255   : > { %s1608_s5 = smov 128   ;;  %s1609_s29 = smov 8  }
 0x256   : > { %1379 = dma.vmem_to_hbm [thread:$0]  (%p1922_p1), %s1844_s22, 256, %s1849_s27, %s1855_s6, %s1608_s5, %s1608_s5, %s1609_s29  }
 0x257 PF: > { %s1094_s23 = sand.u32 1, %s1588_s12   ;;  %p1923_p2 = scmp.ne.s32.totalorder %s1909_s25, 0 }
 0x258   : > { %p1924_p5 = scmp.ge.s32.totalorder %s1600_s15, 2  ;;  %s1095_s11 = scalar_lea.sflag [#allocation4], %s1094_s23 }
 0x25a   : > { %p1393_p11 = pnand %p1924_p5, %p1923_p2 }
 0x25c   : > { %1583 = dma.done.wait (!%p1393_p11), %s1095_s11, 256  }
 0x25d   : > { %1585 = vsyncadd (!%p1393_p11), %s1095_s11, 4294967040  ;;  %p15_p12 = scmp.ge.s32.totalorder %s1655_s18, 4   ;;  %s1925_s12 = smov %s1592_s13 }
 0x25e   : > { %s1926_s13 = smov %s1596_s14  ;;  %s1927_s14 = smov %s1667_s21 }
 0x25f   : > { %s1928_s15 = smov %s1655_s18  ;;  %17 = sbr.rel (!%p15_p12) target bundleno = 5 (0x5), region = 92 }
 0x266   :  { %1100 = vsyncpa [#allocation3], 1 }
 0x267   :  { %1102 = vsyncpa [#allocation3 + $0x1], 1 }
 0x268   :  { %1103 = vsyncpa [#allocation6], 1 }
 0x269   :  { %1104 = vsyncpa [#allocation4], 1 }
 0x26a   :  { %1106 = vsyncpa [#allocation4 + $0x1], 1 }

</bundles_post_ra>
